<compile_context>
chip_gen: v6e
topology: v6e:2x2x1
jax: 0.10.0
libtpu: 0.0.40
codegen_flags: <defaults>
</compile_context>

<pallas_src>
import functools

import jax
import jax.numpy as jnp
from jax.experimental import pallas as pl
from jax.experimental.pallas import tpu as pltpu


def _rhs_t_dot(a, b):
    # a @ b.T with f32 accumulation on the MXU (operands are bf16).
    return jax.lax.dot_general(a, b, (((1,), (1,)), ((), ())),
                               preferred_element_type=jnp.float32)


def _triplet_loss_kernel(x_ref, t_col_ref, t_row_ref, o_ref,
                         gram_acc, m_acc, l_acc, xt_acc,
                         *, feat_dim, margin, needs_mask, split_gram):
    # x_ref:     (N, TILE_D) logits/features block (native dtype)
    # t_col_ref: (N, 1) int32 targets (column layout)
    # t_row_ref: (1, N) int32 targets (row layout, avoids in-kernel transpose)
    # o_ref:     (1, 1) f32 scalar loss in SMEM
    k = pl.program_id(0)
    nk = pl.num_programs(0)
    n, tile_d = x_ref.shape

    @pl.when(k == 0)
    def _init():
        gram_acc[...] = jnp.zeros_like(gram_acc)
        m_acc[...] = jnp.full_like(m_acc, -jnp.inf)
        l_acc[...] = jnp.zeros_like(l_acc)
        xt_acc[...] = jnp.zeros_like(xt_acc)

    x = x_ref[...].astype(jnp.float32)                       # cast in-kernel
    t_col = t_col_ref[...]                                   # (N, 1) int32
    # Global column (class) ids — needed for the target-logit gather on every
    # step regardless of masking.
    col_global = (jax.lax.broadcasted_iota(jnp.int32, (n, tile_d), 1)
                  + k * tile_d)

    def _accumulate(masked):
        if masked:
            # Only emitted for the (padded) last tile when D % TILE_D != 0.
            valid = col_global < feat_dim
            x_mm = jnp.where(valid, x, 0.0)
            x_lse = jnp.where(valid, x, -jnp.inf)
        else:
            x_mm = x
            x_lse = x

        # ---- Gram accumulation on the MXU: gram += x @ x.T ----
        if split_gram:
            # bf16 hi/lo split: 3 single-pass bf16 matmuls ~= bf16x3 (HIGH)
            # accuracy with f32 accumulation; lo@lo term (~2^-18 rel.) dropped.
            hi = x_mm.astype(jnp.bfloat16)
            lo = (x_mm - hi.astype(jnp.float32)).astype(jnp.bfloat16)
            g = (_rhs_t_dot(hi, hi) + _rhs_t_dot(hi, lo) + _rhs_t_dot(lo, hi))
        else:
            xb = x_mm.astype(jnp.bfloat16)
            g = _rhs_t_dot(xb, xb)
        gram_acc[...] += g

        # ---- Target-logit gather (masked-where, no materialized one-hot) ----
        # Padded columns have col_global >= feat_dim > any target -> never hit.
        xt_acc[...] += jnp.sum(jnp.where(col_global == t_col, x, 0.0),
                               axis=-1, keepdims=True)

        # ---- Online log-sum-exp over the class axis (for CrossEntropy) ----
        m_blk = jnp.max(x_lse, axis=-1, keepdims=True)
        m_old = m_acc[...]
        m_new = jnp.maximum(m_old, m_blk)
        l_acc[...] = (l_acc[...] * jnp.exp(m_old - m_new)
                      + jnp.sum(jnp.exp(x_lse - m_new), axis=-1, keepdims=True))
        m_acc[...] = m_new

    if not needs_mask:
        # Static fast path: tile divides D, no mask ops emitted at all.
        _accumulate(False)
    else:
        @pl.when(k < nk - 1)
        def _interior():
            _accumulate(False)

        @pl.when(k == nk - 1)
        def _tail():
            _accumulate(True)

    @pl.when(k == nk - 1)
    def _finalize():
        # Cross-entropy term (mean over the true N rows).
        lse = m_acc[...] + jnp.log(l_acc[...])
        ce = lse - xt_acc[...]                               # (N, 1)
        loss_ce = jnp.sum(ce) / jnp.float32(n)

        # Pairwise squared distances from the gram matrix (diag = ||x_i||^2).
        # Build the eye-masked gram once and share it for both diagonal
        # orientations (one select instead of two).
        gram = gram_acc[...]
        row_ids = jax.lax.broadcasted_iota(jnp.int32, (n, n), 0)
        col_ids = jax.lax.broadcasted_iota(jnp.int32, (n, n), 1)
        gd = jnp.where(row_ids == col_ids, gram, 0.0)
        sq_col = jnp.sum(gd, axis=1, keepdims=True)          # (N, 1)
        sq_row = jnp.sum(gd, axis=0, keepdims=True)          # (1, N)
        dist = jnp.sqrt(jnp.maximum(sq_col + sq_row - 2.0 * gram, 1e-12))

        # Hard positive/negative mining via masked max/min (no Python loop).
        same = t_col == t_row_ref[...]                       # (N, N) bool
        dist_ap = jnp.max(jnp.where(same, dist, -jnp.inf), axis=1, keepdims=True)
        dist_an = jnp.min(jnp.where(same, jnp.inf, dist), axis=1, keepdims=True)

        # MarginRankingLoss(margin)(dist_an, dist_ap, y=1)
        loss_trip = jnp.sum(jnp.maximum(margin + dist_ap - dist_an, 0.0)) \
            / jnp.float32(n)

        o_ref[0, 0] = loss_ce + loss_trip


def _plan(n, d, itemsize):
    """Pick the feature-dim tile and an explicit scoped-VMEM limit.

    Generation-aware: queries physical VMEM (128 MiB on v5e/v6e, 64 MiB per
    core on v7x) and budgets the (N,N) gram accumulator + finalize temporaries
    before sizing the double-buffered (N, TILE_D) streamed input tile."""
    try:
        phys = int(pltpu.get_tpu_info().vmem_capacity_bytes)
    except Exception:
        phys = 64 << 20                    # assume the smallest (v7x) budget

    f32 = 4
    gram_bytes = f32 * n * n
    # dist/same/masked copies etc. live together in finalize (see TODO above).
    finalize_bytes = 8 * f32 * n * n
    # Small accumulators + lane-padded target blocks.
    small_bytes = f32 * (4 * n * 128) + 4 * 2 * max(n, 128) * 8

    budget = min((phys * 3) // 4, 96 << 20)
    avail = max(budget - gram_bytes - finalize_bytes - small_bytes, 4 << 20)
    per_buf = avail // 2                   # double-buffered streamed input

    tile_d = min(d, max(1, per_buf // max(1, n * itemsize)))
    if tile_d < d:
        tile_d = max(128, (tile_d // 128) * 128)
        tile_d = min(tile_d, d)
        # Prefer a tile that divides D (skips the masked-tail path entirely)
        # as long as it stays within ~2/3 of the budget-optimal tile.
        if tile_d < d and d % tile_d != 0:
            lo = max(128, (2 * tile_d) // 3)
            for cand in range(tile_d, lo - 1, -128):
                if d % cand == 0:
                    tile_d = cand
                    break

    need = (gram_bytes + finalize_bytes + small_bytes
            + 2 * n * tile_d * itemsize)
    vmem_limit = int(min(phys, max(need + (16 << 20), 32 << 20)))
    return tile_d, vmem_limit


def triplet_loss(inputs, targets, *, margin=1.0, gram_precision="high"):
    """inputs: (N, D) features/logits (any float dtype); targets: (N,) int
    class indices (must be < D). Returns the scalar TripletLoss forward value.

    gram_precision: "high" (default) -> 3-pass bf16 hi/lo split for f32 inputs
    (~Precision.HIGH accuracy); "default" -> single bf16 MXU pass."""
    n, d = inputs.shape
    t = targets.astype(jnp.int32)
    t_col = t.reshape(n, 1)
    t_row = t.reshape(1, n)

    tile_d, vmem_limit = _plan(n, d, inputs.dtype.itemsize)
    grid = (pl.cdiv(d, tile_d),)
    needs_mask = (d % tile_d) != 0
    split_gram = (gram_precision == "high") and inputs.dtype.itemsize >= 4

    kernel = functools.partial(_triplet_loss_kernel,
                               feat_dim=d, margin=float(margin),
                               needs_mask=needs_mask, split_gram=split_gram)
    out = pl.pallas_call(
        kernel,
        out_shape=jax.ShapeDtypeStruct((1, 1), jnp.float32),
        grid_spec=pltpu.PrefetchScalarGridSpec(
            num_scalar_prefetch=0,
            grid=grid,
            in_specs=[
                # Streamed features; default 2-deep pipelining.  If profiling
                # shows exposed DMA after the per-step compute shrank, bump to
                # pipeline_mode=pl.Buffered(3) (costs one extra tile of VMEM).
                pl.BlockSpec((n, tile_d), lambda k: (0, k)),
                pl.BlockSpec((n, 1), lambda k: (0, 0)),        # targets (col)
                pl.BlockSpec((1, n), lambda k: (0, 0)),        # targets (row)
            ],
            out_specs=pl.BlockSpec((1, 1), lambda k: (0, 0),
                                   memory_space=pltpu.MemorySpace.SMEM),
            scratch_shapes=[
                pltpu.VMEM((n, n), jnp.float32),   # gram accumulator
                pltpu.VMEM((n, 1), jnp.float32),   # running max (lse)
                pltpu.VMEM((n, 1), jnp.float32),   # running sum-exp (lse)
                pltpu.VMEM((n, 1), jnp.float32),   # target logit
            ],
        ),
        compiler_params=pltpu.CompilerParams(
            # D is a reduction axis with resident accumulators -> arbitrary.
            dimension_semantics=("arbitrary",),
            vmem_limit_bytes=vmem_limit,
        ),
    )(inputs, t_col, t_row)
    return out[0, 0]


def _triplet_loss_ref(inputs, targets, *, margin=1.0):
    # Pure-JAX reference mirroring the PyTorch forward.
    x = inputs.astype(jnp.float32)
    t = targets.astype(jnp.int32)
    lse = jax.scipy.special.logsumexp(x, axis=-1)
    x_t = jnp.take_along_axis(x, t[:, None], axis=-1)[:, 0]
    loss_ce = jnp.mean(lse - x_t)

    diff = x[:, None, :] - x[None, :, :]
    dist = jnp.sqrt(jnp.clip(jnp.sum(diff * diff, axis=-1), 1e-12, None))
    same = t[:, None] == t[None, :]
    dist_ap = jnp.max(jnp.where(same, dist, -jnp.inf), axis=1)
    dist_an = jnp.min(jnp.where(same, jnp.inf, dist), axis=1)
    loss_trip = jnp.mean(jnp.maximum(margin + dist_ap - dist_an, 0.0))
    return loss_ce + loss_trip


if __name__ == "__main__":
    key = jax.random.PRNGKey(0)

    N, D = 8, 32   # batch of 8 feature vectors / logits over 32 classes
    inputs = jax.random.normal(key, (N, D), dtype=jnp.float32)
    # Each sample has at least one positive and one negative (as required
    # by hard mining / the original PyTorch loop).
    targets = jnp.array([0, 0, 1, 1, 2, 2, 3, 3], dtype=jnp.int32)

    out = triplet_loss(inputs, targets, margin=1.0)
    jax.block_until_ready(out)

    ref = _triplet_loss_ref(inputs, targets, margin=1.0)
    assert jnp.allclose(out, ref, rtol=2e-3, atol=2e-3), (out, ref)

    print("KERNEL_OK")
</pallas_src>

<mosaic_0001>
module attributes {stable_mosaic.version = 11 : i64} {
  func.func @_triplet_loss_kernel(%arg0: i32, %arg1: memref<8x32xf32, #tpu.memory_space<vmem>>, %arg2: memref<8x1xi32, #tpu.memory_space<vmem>>, %arg3: memref<1x8xi32, #tpu.memory_space<vmem>>, %arg4: memref<1x1xf32, #tpu.memory_space<smem>>, %arg5: memref<8x8xf32, #tpu.memory_space<vmem>>, %arg6: memref<8x1xf32, #tpu.memory_space<vmem>>, %arg7: memref<8x1xf32, #tpu.memory_space<vmem>>, %arg8: memref<8x1xf32, #tpu.memory_space<vmem>>) attributes {dimension_semantics = [#tpu.dimension_semantics<arbitrary>], iteration_bounds = array<i64: 1>, scalar_prefetch = 0 : i64, scratch_operands = 4 : i64, tpu.core_type = #tpu.core_type<tc>, window_params = [{transform_indices = @transform_0, window_bounds = array<i64: 8, 32>}, {pipeline_mode = #tpu.pipeline_mode<synchronous>, transform_indices = @transform_1, window_bounds = array<i64: 8, 1>}, {pipeline_mode = #tpu.pipeline_mode<synchronous>, transform_indices = @transform_2, window_bounds = array<i64: 1, 8>}, {transform_indices = @transform_3, window_bounds = array<i64: 1, 1>}]} {
    %c0_i32 = arith.constant 0 : i32
    %0 = arith.cmpi eq, %arg0, %c0_i32 : i32
    %1 = arith.extui %0 : i1 to i32
    %c0_i32_0 = arith.constant 0 : i32
    %2 = arith.cmpi ne, %1, %c0_i32_0 : i32
    scf.if %2 {
      %cst_28 = arith.constant 0.000000e+00 : f32
      %49 = vector.broadcast %cst_28 : f32 to vector<8x8xf32>
      %c0_29 = arith.constant 0 : index
      %c0_30 = arith.constant 0 : index
      %50 = vector.load %arg5[%c0_29, %c0_30] : memref<8x8xf32, #tpu.memory_space<vmem>>, vector<8x8xf32>
      tpu.vector_store %arg5[%c0_29, %c0_30], %49 {strides = array<i32>} : memref<8x8xf32, #tpu.memory_space<vmem>>, vector<8x8xf32>,
      %cst_31 = arith.constant 0xFF800000 : f32
      %51 = vector.broadcast %cst_31 : f32 to vector<8x1xf32>
      %c0_32 = arith.constant 0 : index
      %c0_33 = arith.constant 0 : index
      %52 = vector.load %arg6[%c0_32, %c0_33] : memref<8x1xf32, #tpu.memory_space<vmem>>, vector<8x1xf32>
      tpu.vector_store %arg6[%c0_32, %c0_33], %51 {strides = array<i32>} : memref<8x1xf32, #tpu.memory_space<vmem>>, vector<8x1xf32>,
      %cst_34 = arith.constant 0.000000e+00 : f32
      %53 = vector.broadcast %cst_34 : f32 to vector<8x1xf32>
      %c0_35 = arith.constant 0 : index
      %c0_36 = arith.constant 0 : index
      %54 = vector.load %arg7[%c0_35, %c0_36] : memref<8x1xf32, #tpu.memory_space<vmem>>, vector<8x1xf32>
      tpu.vector_store %arg7[%c0_35, %c0_36], %53 {strides = array<i32>} : memref<8x1xf32, #tpu.memory_space<vmem>>, vector<8x1xf32>,
      %cst_37 = arith.constant 0.000000e+00 : f32
      %55 = vector.broadcast %cst_37 : f32 to vector<8x1xf32>
      %c0_38 = arith.constant 0 : index
      %c0_39 = arith.constant 0 : index
      %56 = vector.load %arg8[%c0_38, %c0_39] : memref<8x1xf32, #tpu.memory_space<vmem>>, vector<8x1xf32>
      tpu.vector_store %arg8[%c0_38, %c0_39], %55 {strides = array<i32>} : memref<8x1xf32, #tpu.memory_space<vmem>>, vector<8x1xf32>,
    } else {
    }
    %c0 = arith.constant 0 : index
    %c0_1 = arith.constant 0 : index
    %3 = vector.load %arg1[%c0, %c0_1] : memref<8x32xf32, #tpu.memory_space<vmem>>, vector<8x32xf32>
    %c0_2 = arith.constant 0 : index
    %c0_3 = arith.constant 0 : index
    %4 = vector.load %arg2[%c0_2, %c0_3] : memref<8x1xi32, #tpu.memory_space<vmem>>, vector<8x1xi32>
    %5 = tpu.iota {dimensions = array<i32: 1>} : vector<8x32xi32>
    %c32_i32 = arith.constant 32 : i32
    %6 = arith.muli %arg0, %c32_i32 : i32
    %7 = vector.broadcast %6 : i32 to vector<8x32xi32>
    %8 = arith.addi %5, %7 : vector<8x32xi32>
    %9 = arith.truncf %3 : vector<8x32xf32> to vector<8x32xbf16>
    %10 = arith.extf %9 : vector<8x32xbf16> to vector<8x32xf32>
    %11 = arith.subf %3, %10 : vector<8x32xf32>
    %12 = arith.truncf %11 : vector<8x32xf32> to vector<8x32xbf16>
    %cst = arith.constant dense<0.000000e+00> : vector<8x8xf32>
    %13 = tpu.matmul %9, %9, %cst {dimension_numbers = #tpu.dot_dimension_numbers<[1], [1], [0], [0], [0, 0, 1, 0], [], []>} : vector<8x32xbf16>, vector<8x32xbf16>, vector<8x8xf32> -> vector<8x8xf32>
    %cst_4 = arith.constant dense<0.000000e+00> : vector<8x8xf32>
    %14 = tpu.matmul %9, %12, %cst_4 {dimension_numbers = #tpu.dot_dimension_numbers<[1], [1], [0], [0], [0, 0, 1, 0], [], []>} : vector<8x32xbf16>, vector<8x32xbf16>, vector<8x8xf32> -> vector<8x8xf32>
    %15 = arith.addf %13, %14 : vector<8x8xf32>
    %cst_5 = arith.constant dense<0.000000e+00> : vector<8x8xf32>
    %16 = tpu.matmul %12, %9, %cst_5 {dimension_numbers = #tpu.dot_dimension_numbers<[1], [1], [0], [0], [0, 0, 1, 0], [], []>} : vector<8x32xbf16>, vector<8x32xbf16>, vector<8x8xf32> -> vector<8x8xf32>
    %17 = arith.addf %15, %16 : vector<8x8xf32>
    %c0_6 = arith.constant 0 : index
    %c0_7 = arith.constant 0 : index
    %18 = vector.load %arg5[%c0_6, %c0_7] : memref<8x8xf32, #tpu.memory_space<vmem>>, vector<8x8xf32>
    %19 = arith.addf %18, %17 : vector<8x8xf32>
    %c0_8 = arith.constant 0 : index
    %c0_9 = arith.constant 0 : index
    %20 = vector.load %arg5[%c0_8, %c0_9] : memref<8x8xf32, #tpu.memory_space<vmem>>, vector<8x8xf32>
    tpu.vector_store %arg5[%c0_8, %c0_9], %19 {strides = array<i32>} : memref<8x8xf32, #tpu.memory_space<vmem>>, vector<8x8xf32>,
    %c0_10 = arith.constant 0 : index
    %c0_11 = arith.constant 0 : index
    %21 = vector.load %arg8[%c0_10, %c0_11] : memref<8x1xf32, #tpu.memory_space<vmem>>, vector<8x1xf32>
    %22 = vector.broadcast %4 : vector<8x1xi32> to vector<8x32xi32>
    %23 = arith.cmpi eq, %8, %22 : vector<8x32xi32>
    %cst_12 = arith.constant 0.000000e+00 : f32
    %24 = vector.broadcast %cst_12 : f32 to vector<8x32xf32>
    %25 = arith.select %23, %3, %24 : vector<8x32xi1>, vector<8x32xf32>
    %cst_13 = arith.constant dense<0.000000e+00> : vector<8xf32>
    %26 = vector.multi_reduction <add>, %25, %cst_13 [1] : vector<8x32xf32> to vector<8xf32>
    %27 = vector.shape_cast %26 : vector<8xf32> to vector<8x1xf32>
    %28 = arith.addf %21, %27 : vector<8x1xf32>
    %c0_14 = arith.constant 0 : index
    %c0_15 = arith.constant 0 : index
    %29 = vector.load %arg8[%c0_14, %c0_15] : memref<8x1xf32, #tpu.memory_space<vmem>>, vector<8x1xf32>
    tpu.vector_store %arg8[%c0_14, %c0_15], %28 {strides = array<i32>} : memref<8x1xf32, #tpu.memory_space<vmem>>, vector<8x1xf32>,
    %cst_16 = arith.constant dense<0xFF800000> : vector<8xf32>
    %30 = vector.multi_reduction <maximumf>, %3, %cst_16 [1] : vector<8x32xf32> to vector<8xf32>
    %31 = vector.shape_cast %30 : vector<8xf32> to vector<8x1xf32>
    %c0_17 = arith.constant 0 : index
    %c0_18 = arith.constant 0 : index
    %32 = vector.load %arg6[%c0_17, %c0_18] : memref<8x1xf32, #tpu.memory_space<vmem>>, vector<8x1xf32>
    %33 = arith.maximumf %32, %31 : vector<8x1xf32>
    %c0_19 = arith.constant 0 : index
    %c0_20 = arith.constant 0 : index
    %34 = vector.load %arg7[%c0_19, %c0_20] : memref<8x1xf32, #tpu.memory_space<vmem>>, vector<8x1xf32>
    %35 = arith.subf %32, %33 : vector<8x1xf32>
    %36 = math.exp %35 : vector<8x1xf32>
    %37 = arith.mulf %34, %36 : vector<8x1xf32>
    %38 = vector.broadcast %33 : vector<8x1xf32> to vector<8x32xf32>
    %39 = arith.subf %3, %38 : vector<8x32xf32>
    %40 = math.exp %39 : vector<8x32xf32>
    %cst_21 = arith.constant dense<0.000000e+00> : vector<8xf32>
    %41 = vector.multi_reduction <add>, %40, %cst_21 [1] : vector<8x32xf32> to vector<8xf32>
    %42 = vector.shape_cast %41 : vector<8xf32> to vector<8x1xf32>
    %43 = arith.addf %37, %42 : vector<8x1xf32>
    %c0_22 = arith.constant 0 : index
    %c0_23 = arith.constant 0 : index
    %44 = vector.load %arg7[%c0_22, %c0_23] : memref<8x1xf32, #tpu.memory_space<vmem>>, vector<8x1xf32>
    tpu.vector_store %arg7[%c0_22, %c0_23], %43 {strides = array<i32>} : memref<8x1xf32, #tpu.memory_space<vmem>>, vector<8x1xf32>,
    %c0_24 = arith.constant 0 : index
    %c0_25 = arith.constant 0 : index
    %45 = vector.load %arg6[%c0_24, %c0_25] : memref<8x1xf32, #tpu.memory_space<vmem>>, vector<8x1xf32>
    tpu.vector_store %arg6[%c0_24, %c0_25], %33 {strides = array<i32>} : memref<8x1xf32, #tpu.memory_space<vmem>>, vector<8x1xf32>,
    %c0_i32_26 = arith.constant 0 : i32
    %46 = arith.cmpi eq, %arg0, %c0_i32_26 : i32
    %47 = arith.extui %46 : i1 to i32
    %c0_i32_27 = arith.constant 0 : i32
    %48 = arith.cmpi ne, %47, %c0_i32_27 : i32
    scf.if %48 {
      %c0_28 = arith.constant 0 : index
      %c0_29 = arith.constant 0 : index
      %49 = vector.load %arg6[%c0_28, %c0_29] : memref<8x1xf32, #tpu.memory_space<vmem>>, vector<8x1xf32>
      %c0_30 = arith.constant 0 : index
      %c0_31 = arith.constant 0 : index
      %50 = vector.load %arg7[%c0_30, %c0_31] : memref<8x1xf32, #tpu.memory_space<vmem>>, vector<8x1xf32>
      %51 = math.log %50 : vector<8x1xf32>
      %52 = arith.addf %49, %51 : vector<8x1xf32>
      %c0_32 = arith.constant 0 : index
      %c0_33 = arith.constant 0 : index
      %53 = vector.load %arg8[%c0_32, %c0_33] : memref<8x1xf32, #tpu.memory_space<vmem>>, vector<8x1xf32>
      %54 = arith.subf %52, %53 : vector<8x1xf32>
      %55 = vector.shape_cast %54 : vector<8x1xf32> to vector<1x8x1xf32>
      %cst_34 = arith.constant dense<0.000000e+00> : vector<1xf32>
      %56 = vector.multi_reduction <add>, %55, %cst_34 [1, 2] : vector<1x8x1xf32> to vector<1xf32>
      %57 = vector.shape_cast %56 : vector<1xf32> to vector<1x1x1xf32>
      %58 = vector.extract %57[0, 0, 0] : f32 from vector<1x1x1xf32>
      %cst_35 = arith.constant 8.000000e+00 : f32
      %59 = arith.divf %58, %cst_35 : f32
      %c0_36 = arith.constant 0 : index
      %c0_37 = arith.constant 0 : index
      %60 = vector.load %arg5[%c0_36, %c0_37] : memref<8x8xf32, #tpu.memory_space<vmem>>, vector<8x8xf32>
      %61 = tpu.iota {dimensions = array<i32: 0>} : vector<8x8xi32>
      %62 = tpu.iota {dimensions = array<i32: 1>} : vector<8x8xi32>
      %63 = arith.cmpi eq, %61, %62 : vector<8x8xi32>
      %cst_38 = arith.constant 0.000000e+00 : f32
      %64 = vector.broadcast %cst_38 : f32 to vector<8x8xf32>
      %65 = arith.select %63, %60, %64 : vector<8x8xi1>, vector<8x8xf32>
      %cst_39 = arith.constant dense<0.000000e+00> : vector<8xf32>
      %66 = vector.multi_reduction <add>, %65, %cst_39 [1] : vector<8x8xf32> to vector<8xf32>
      %67 = vector.shape_cast %66 : vector<8xf32> to vector<8x1xf32>
      %cst_40 = arith.constant dense<0.000000e+00> : vector<8xf32>
      %68 = vector.multi_reduction <add>, %65, %cst_40 [0] : vector<8x8xf32> to vector<8xf32>
      %69 = vector.shape_cast %68 : vector<8xf32> to vector<1x8xf32>
      %70 = vector.broadcast %67 : vector<8x1xf32> to vector<8x8xf32>
      %71 = vector.broadcast %69 : vector<1x8xf32> to vector<8x8xf32>
      %72 = arith.addf %70, %71 : vector<8x8xf32>
      %cst_41 = arith.constant 2.000000e+00 : f32
      %73 = vector.broadcast %cst_41 : f32 to vector<8x8xf32>
      %74 = arith.mulf %73, %60 : vector<8x8xf32>
      %75 = arith.subf %72, %74 : vector<8x8xf32>
      %cst_42 = arith.constant 9.99999996E-13 : f32
      %76 = vector.broadcast %cst_42 : f32 to vector<8x8xf32>
      %77 = arith.maximumf %75, %76 : vector<8x8xf32>
      %78 = math.sqrt %77 : vector<8x8xf32>
      %c0_43 = arith.constant 0 : index
      %c0_44 = arith.constant 0 : index
      %79 = vector.load %arg3[%c0_43, %c0_44] : memref<1x8xi32, #tpu.memory_space<vmem>>, vector<1x8xi32>
      %80 = vector.broadcast %4 : vector<8x1xi32> to vector<8x8xi32>
      %81 = vector.broadcast %79 : vector<1x8xi32> to vector<8x8xi32>
      %82 = arith.cmpi eq, %80, %81 : vector<8x8xi32>
      %cst_45 = arith.constant 0xFF800000 : f32
      %83 = vector.broadcast %cst_45 : f32 to vector<8x8xf32>
      %84 = arith.select %82, %78, %83 : vector<8x8xi1>, vector<8x8xf32>
      %cst_46 = arith.constant dense<0xFF800000> : vector<8xf32>
      %85 = vector.multi_reduction <maximumf>, %84, %cst_46 [1] : vector<8x8xf32> to vector<8xf32>
      %86 = vector.shape_cast %85 : vector<8xf32> to vector<8x1xf32>
      %cst_47 = arith.constant 0x7F800000 : f32
      %87 = vector.broadcast %cst_47 : f32 to vector<8x8xf32>
      %88 = arith.select %82, %87, %78 : vector<8x8xi1>, vector<8x8xf32>
      %cst_48 = arith.constant dense<0x7F800000> : vector<8xf32>
      %89 = vector.multi_reduction <minimumf>, %88, %cst_48 [1] : vector<8x8xf32> to vector<8xf32>
      %90 = vector.shape_cast %89 : vector<8xf32> to vector<8x1xf32>
      %cst_49 = arith.constant 1.000000e+00 : f32
      %91 = vector.broadcast %cst_49 : f32 to vector<8x1xf32>
      %92 = arith.addf %91, %86 : vector<8x1xf32>
      %93 = arith.subf %92, %90 : vector<8x1xf32>
      %cst_50 = arith.constant 0.000000e+00 : f32
      %94 = vector.broadcast %cst_50 : f32 to vector<8x1xf32>
      %95 = arith.maximumf %93, %94 : vector<8x1xf32>
      %96 = vector.shape_cast %95 : vector<8x1xf32> to vector<1x8x1xf32>
      %cst_51 = arith.constant dense<0.000000e+00> : vector<1xf32>
      %97 = vector.multi_reduction <add>, %96, %cst_51 [1, 2] : vector<1x8x1xf32> to vector<1xf32>
      %98 = vector.shape_cast %97 : vector<1xf32> to vector<1x1x1xf32>
      %99 = vector.extract %98[0, 0, 0] : f32 from vector<1x1x1xf32>
      %cst_52 = arith.constant 8.000000e+00 : f32
      %100 = arith.divf %99, %cst_52 : f32
      %101 = arith.addf %59, %100 : f32
      %c0_53 = arith.constant 0 : index
      %c0_54 = arith.constant 0 : index
      %102 = memref.load %arg4[%c0_53, %c0_54] : memref<1x1xf32, #tpu.memory_space<smem>>
      memref.store %101, %arg4[%c0_53, %c0_54] : memref<1x1xf32, #tpu.memory_space<smem>>
    } else {
    }
    return
  }
  func.func @transform_0(%arg0: i32) -> (i32, i32) {
    %c0_i32 = arith.constant 0 : i32
    %c0_i32_0 = arith.constant 0 : i32
    return %c0_i32, %arg0 : i32, i32
  }
  func.func @transform_1(%arg0: i32) -> (i32, i32) {
    %c0_i32 = arith.constant 0 : i32
    %c0_i32_0 = arith.constant 0 : i32
    %c0_i32_1 = arith.constant 0 : i32
    return %c0_i32, %c0_i32_0 : i32, i32
  }
  func.func @transform_2(%arg0: i32) -> (i32, i32) {
    %c0_i32 = arith.constant 0 : i32
    %c0_i32_0 = arith.constant 0 : i32
    %c0_i32_1 = arith.constant 0 : i32
    return %c0_i32, %c0_i32_0 : i32, i32
  }
  func.func @transform_3(%arg0: i32) -> (i32, i32) {
    %c0_i32 = arith.constant 0 : i32
    %c0_i32_0 = arith.constant 0 : i32
    %c0_i32_1 = arith.constant 0 : i32
    return %c0_i32, %c0_i32_0 : i32, i32
  }
}

</mosaic_0001>

<bundles_post_ra>
// kernel: tpu_custom_call.1
= control target key start
LH: loop header
LB: loop body
LE: loop exit
PB: predicated region body
PF: predicated region fallthrough
CT: control target
= control target key end

     0   :  { %vm37_vm0 = vcmask 261120   ;;  %s437_s0 = inlined_call_operand.vmem [shape: f32[8,32], index: 0, kind: input, shape index: {}]   ;;  %s438_s1 = inlined_call_operand.vmem [shape: s32[8,1], index: 1, kind: input, shape index: {}]   ;;  %s439_s2 = inlined_call_operand.vmem [shape: s32[1,8], index: 2, kind: input, shape index: {}]   ;;  %s440_s3 = inlined_call_operand.hbm [shape: f32[1,1], index: 3, kind: output, shape index: {}]  }
   0x1   :  { %v384_v0 = vld [vmem:[%s437_s0] sm:$0xff] }
   0x2   :  { %8 = vsyncpa [#allocation7], 0  ;;  %v181_v1 = vsel %vm37_vm0, %v384_v0, -inf  ;;  %v33_v2 = vpack.c.bf16 %v384_v0, %v384_v0  ;;  %v356_v3 = vmov 0.0   ;;  %vm357_vm1 = vmmov 0   ;;  %v27_v37 = vld [vmem:[%s438_s1] sm:$0xff] }
   0x3   :  { %309 = vmatprep.subr.bf16.mxu0 %v356_v3  ;;  %315 = vmatprep.subr.bf16.mxu1 %v356_v3  ;;  %vm22_vm2 = vcmask 7168   ;;  %v358_v6 = vmov -inf   ;;  %v359_v10 = vmov 0   ;;  %vm20_vm3 = vcmask 64512   ;;  %v302_v58 = vld [vmem:[%s439_s2] ss:$0 sm:$0xff] }
   0x4   :  { %182 = vmax.xlane.f32.xlu0 %v181_v1  ;;  %311 = vmatprep.mubr.msk.bf16.mxu0 %vm357_vm1, %v356_v3  ;;  %v34_v4 = vunpack.c.l.bf16 %v33_v2  ;;  %v39_v5 = vsel %vm37_vm0, %v33_v2, 0  ;;  %23 = vst.msk [vmem:[#allocation3] sm:$0xff] %vm22_vm2, %v358_v6  ;;  %24 = vst.msk [vmem:[#allocation4] sm:$0xff] %vm22_vm2, %v356_v3  ;;  %v28_v28 = vlaneseq  ;;  %s360_s20 = smov [#allocation6]  }
   0x5   :  { %317 = vmatprep.mubr.msk.bf16.mxu1 %vm357_vm1, %v356_v3  ;;  %316 = vmatpush3.bf16.xpose.msra.mxu1 %v39_v5  ;;  %25 = vst.msk [vmem:[#allocation5] sm:$0xff] %vm22_vm2, %v356_v3 }
   0x6   :  { %v35_v7 = vsub.f32 %v384_v0, %v34_v4  ;;  %336 = vset.pattern.permute.xlu0 %v359_v10  ;;  %337 = vset.pattern.permute.xlu1 %v359_v10  ;;  %21 = vst.msk [vmem:[#allocation2] sm:$0xff] %vm20_vm3, %v356_v3  ;;  %v29_v32 = vand.u32 127, %v28_v28  ;;  %v230_v33 = vshrl.u32 %v28_v28, 7 }
   0x8   :  { %v36_v8 = vpack.c.bf16 %v35_v7, %v35_v7  ;;  %vm231_vm4 = vcmp.eq.s32.totalorder %v230_v33, %v29_v32 }
   0xa   :  { %v42_v9 = vsel %vm37_vm0, %v36_v8, 0 }
   0xb   :  { %310 = vmatpush3.bf16.xpose.msra.mxu0 %v42_v9  ;;  %v403_v11 = vld [vmem:[#allocation3] sm:$0xff] }
   0xc   :  { %321 = vmatprep.subr.bf16.mxu0 %v356_v3  ;;  %318 = vmatmul.mubr.msk.bf16.vlgmr.msra.gmra.mxu1 %vm37_vm0, %v33_v2  ;;  %v169_v10 = vld [vmem:[#allocation5] sm:$0xff] }
   0xd   :  { %v165_v25 = vld [vmem:[#allocation2] sm:$0xff] }
  0x12   :  { %312 = vmatmul.mubr.msk.bf16.vlgmr.msra.gmra.mxu0 %vm37_vm0, %v33_v2 }
  0x13   :  { %322 = vmatpush3.bf16.xpose.msra.mxu0 %v39_v5  ;;  %323 = vmatprep.mubr.msk.bf16.mxu0 %vm357_vm1, %v356_v3  ;;  %v186_v5 = vld [vmem:[#allocation4] sm:$0xff] }
  0x1a   :  { %324 = vmatmul.mubr.msk.bf16.vlgmr.msra.gmra.mxu0 %vm37_vm0, %v36_v8 }
  0x8d   :  { %v183_v12 = vpop.xlane.xlu0 %182 }
  0x8e   :  { %v406_v13 = vmax.f32 %v403_v11, %v183_v12 }
  0x90   :  { %v187_v14 = vsub.f32 %v403_v11, %v406_v13  ;;  %204 = vst.msk [vmem:[#allocation3] sm:$0xff] %vm22_vm2, %v406_v13  ;;  %193 = vperm.xlu0 %336, %v406_v13  }
  0x92   :  { %v188_v3 = vmul.f32 1.442695, %v187_v14 }
  0xcc   :  { %v118_v15 = vpop.f32.mrf.mxu1 }
  0xce   :  { %v319_v16 = vpop.f32.mrf.mxu1 }
  0xd0   :  { %v121_v17 = vpop.f32.mrf.mxu1 }
  0xd2   :  { %v78_v18 = vpop.f32.mrf.mxu0  ;;  %v320_v19 = vpop.f32.mrf.mxu1 }
  0xd3   :  { %v119_v23 = vadd.f32 %v118_v15, %v78_v18  ;;  %v208_v18 = vld [vmem:[#allocation3] sm:$0xff] }
  0xd4   :  { %v313_v20 = vpop.f32.mrf.mxu0 }
  0xd6   :  { %v81_v21 = vpop.f32.mrf.mxu0 }
  0xd8   :  { %v314_v22 = vpop.f32.mrf.mxu0 }
  0xda   :  { %v158_v24 = vpop.f32.mrf.mxu0 }
  0xdb   :  { %v164_v26 = vadd.f32 %v158_v24, %v119_v23 }
  0xdc   :  { %v325_v27 = vpop.f32.mrf.mxu0 }
  0xdd   :  { %v166_v29 = vadd.f32 %v165_v25, %v164_v26 }
  0xde   :  { %v161_v30 = vpop.f32.mrf.mxu0 }
  0xdf   :  { %168 = vst.msk [vmem:[#allocation2] sm:$0xff] %vm20_vm3, %v166_v29 }
  0xe0   :  { %v326_v31 = vpop.f32.mrf.mxu0 }
  0xe6   :  { %v228_v34 = vld [vmem:[#allocation2] sm:$0xff] }
  0xe7   :  { %v232_v35 = vsel %vm231_vm4, %v228_v34, 0.0  ;;  %v243_v50 = vmul.f32 2.0, %v228_v34 }
  0xe8   :  { %v233_v36 = vsel %vm20_vm3, %v232_v35, 0.0 }
  0xe9   :  { %234 = vadd.xlane.f32.xlu1 %v233_v36  ;;  %v236_v43 = vrot.slane %v233_v36, 4 }
  0xeb   :  { %v237_v44 = vadd.f32 %v236_v43, %v233_v36 }
  0xed   :  { %v238_v45 = vrot.slane %v237_v44, 2 }
  0xef   :  { %v239_v46 = vadd.f32 %v238_v45, %v237_v44 }
  0xf1   :  { %v240_v47 = vrot.slane %v239_v46, 1 }
  0xf3   :  { %v241_v48 = vadd.f32 %v240_v47, %v239_v46 }
  0xfa   :  { %171 = vperm.xlu1 %337, %v27_v37  }
 0x10b   :  { %v194_v38 = vpop.permute.xlu0 %193 }
 0x10c   :  { %v196_v39 = vsub.f32 %v384_v0, %v194_v38 }
 0x10e   :  { %v197_v40 = vmul.f32 1.442695, %v196_v39 }
 0x110   :  { %338 = vpow2.f32 %v197_v40 }
 0x11d   :  { %v339_v41 = vpop.eup %338 }
 0x11e   :  { %v199_v42 = vsel %vm37_vm0, %v339_v41, 0.0 }
 0x11f   :  { %200 = vadd.xlane.f32.xlu1 %v199_v42 }
 0x172   :  { %v235_v49 = vpop.xlane.xlu1 %234 }
 0x173   :  { %v242_v51 = vadd.f32 %v241_v48, %v235_v49 }
 0x175   :  { %v244_v52 = vsub.f32 %v242_v51, %v243_v50 }
 0x176   :  { %v172_v53 = vpop.permute.xlu1 %171 }
 0x177   :  { %v245_v54 = vmax.f32 %v244_v52, 1e-12  ;;  %vm173_vm5 = vcmp.eq.s32.totalorder %v29_v32, %v172_v53  ;;  %vm258_vm8 = vcmp.eq.s32.totalorder %v172_v53, %v302_v58 }
 0x178   :  { %v174_v55 = vsel %vm173_vm5, %v384_v0, 0.0 }
 0x179   :  { %340 = vrsqrt.f32 %v245_v54  ;;  %v175_v56 = vsel %vm37_vm0, %v174_v55, 0.0  ;;  %vm248_vm6 = vcmp.eq.f32.partialorder %v245_v54, inf  ;;  %v251_v60 = vand.u32 2147483648, %v245_v54 }
 0x17a   :  { %176 = vadd.xlane.f32.xlu0 %v175_v56  ;;  %vm250_vm7 = vcmp.eq.f32.partialorder %v245_v54, 0.0  ;;  %342 = vpow2.f32 %v188_v3 }
 0x186   :  { %v341_v57 = vpop.eup %340 }
 0x187   :  { %v247_v59 = vmul.f32 %v341_v57, %v245_v54  ;;  %v343_v4 = vpop.eup %342 }
 0x188   :  { %v190_v6 = vmul.f32 %v343_v4, %v186_v5 }
 0x189   :  { %v249_v61 = vsel %vm248_vm6, %v245_v54, %v247_v59 }
 0x18a   :  { %v252_v62 = vsel %vm250_vm7, %v251_v60, %v249_v61 }
 0x18b   :  { %v259_v63 = vsel %vm258_vm8, %v252_v62, -inf  ;;  %v263_v0 = vsel %vm258_vm8, inf, %v252_v62 }
 0x18c   :  { %v260_v1 = vsel %vm20_vm3, %v259_v63, -inf  ;;  %v264_v2 = vsel %vm20_vm3, %v263_v0, inf }
 0x18d   :  { %261 = vmax.xlane.f32.xlu1 %v260_v1 }
 0x191   :  { %265 = vmin.xlane.f32.xlu1 %v264_v2 }
 0x1a8   :  { %v201_v7 = vpop.xlane.xlu1 %200 }
 0x1a9   :  { %v202_v8 = vadd.f32 %v201_v7, %v190_v6 }
 0x1ab   :  { %203 = vst.msk [vmem:[#allocation4] sm:$0xff] %vm22_vm2, %v202_v8 }
 0x1b2   :  { %v209_v9 = vld [vmem:[#allocation4] sm:$0xff] }
 0x1b3   :  { %344 = vlog2.f32 %v209_v9 }
 0x1c0   :  { %v345_v16 = vpop.eup %344 }
 0x1c1   :  { %v211_v17 = vmul.f32 0.6931472, %v345_v16 }
 0x1c3   :  { %v212_v11 = vadd.f32 %v211_v17, %v208_v18 }
 0x203   :  { %v177_v12 = vpop.xlane.xlu0 %176 }
 0x204   :  { %v178_v15 = vadd.f32 %v177_v12, %v169_v10 }
 0x206   :  { %180 = vst.msk [vmem:[#allocation5] sm:$0xff] %vm22_vm2, %v178_v15 }
 0x20d   :  { %v213_v13 = vld [vmem:[#allocation5] sm:$0xff] }
 0x20e   :  { %v214_v14 = vsub.f32 %v212_v11, %v213_v13 }
 0x210   :  { %v215_v19 = vsel %vm22_vm2, %v214_v14, 0.0 }
 0x211   :  { %216 = vadd.xlane.f32.xlu1 %v215_v19 }
 0x216   :  { %v262_v20 = vpop.xlane.xlu1 %261 }
 0x217   :  { %v267_v21 = vadd.f32 1.0, %v262_v20 }
 0x21a   :  { %v266_v22 = vpop.xlane.xlu1 %265 }
 0x21b   :  { %v268_v23 = vsub.f32 %v267_v21, %v266_v22 }
 0x21d   :  { %v269_v24 = vmax.f32 %v268_v23, 0.0 }
 0x21f   :  { %v270_v25 = vsel %vm22_vm2, %v269_v24, 0.0 }
 0x220   :  { %271 = vadd.xlane.f32.xlu1 %v270_v25 }
 0x29a   :  { %v217_v26 = vpop.xlane.xlu1 %216 }
 0x29b   :  { %v218_v27 = vrot.slane %v217_v26, 4 }
 0x29d   :  { %v219_v28 = vadd.f32 %v218_v27, %v217_v26 }
 0x29f   :  { %v220_v29 = vrot.slane %v219_v28, 2 }
 0x2a1   :  { %v221_v30 = vadd.f32 %v220_v29, %v219_v28 }
 0x2a3   :  { %v222_v31 = vrot.slane %v221_v30, 1 }
 0x2a5   :  { %v223_v32 = vadd.f32 %v222_v31, %v221_v30 }
 0x2a7   :  { %327 = vpush %v223_v32 }
 0x2a9   :  { %v272_v33 = vpop.xlane.xlu1 %271 }
 0x2aa   :  { %v273_v34 = vrot.slane %v272_v33, 4 }
 0x2ac   :  { %v274_v35 = vadd.f32 %v273_v34, %v272_v33 }
 0x2ae   :  { %v275_v36 = vrot.slane %v274_v35, 2 }
 0x2b0   :  { %v276_v37 = vadd.f32 %v275_v36, %v274_v35 }
 0x2b2   :  { %v277_v38 = vrot.slane %v276_v37, 1 }
 0x2b4   :  { %v278_v39 = vadd.f32 %v277_v38, %v276_v37 }
 0x2b6   :  { %329 = vpush %v278_v39 }
 0x2d8   :  { %s328_s2 = spop %327 }
 0x2d9   :  { %s227_s16 = smul.f32 0.125, %s328_s2 }
 0x2e7   :  { %s330_s17 = spop %329 }
 0x2e8   :  { %s282_s18 = smul.f32 0.125, %s330_s17 }
 0x2ea   :  { %s283_s19 = sadd.f32 %s282_s18, %s227_s16 }
 0x2ec   :  { %285 = sst [smem:[#allocation6]] %s283_s19 }
 0x2ed   :  { %293 = dma.smem_to_hbm %s360_s20, 16, %s440_s3, [#allocation7]  }
 0x2ee   :  { %354 = dma.done.wait [#allocation7], 16  }
 0x2ef   :  { %355 = vsyncadd [#allocation7], 4294967280 }
 0x2f0   :  { %297 = sfence }
 0x2f1   :  { %298 = vsyncpa [#allocation7], 1 }

</bundles_post_ra>
